<compile_context>
chip_gen: v7x
topology: tpu7x:2x2x1
jax: 0.10.0
libtpu: 0.0.40
codegen_flags: <defaults>
</compile_context>

<pallas_src>
import math

import jax
import jax.numpy as jnp
from jax.experimental import pallas as pl
from jax.experimental.pallas import tpu as pltpu

_LANES = 128
_SUBLANES = 8


def _mask_l1_kernel(res_ref, tgt_ref, mask_ref, num_ref, den_ref):
    # Block shapes: inputs (tile_rows, 128); outputs (1, 8, 128) partials.
    r = res_ref[...].astype(jnp.float32)
    t = tgt_ref[...].astype(jnp.float32)
    m = mask_ref[...].astype(jnp.float32)

    masked_l1 = jnp.abs(r - t) * m

    tile_rows = masked_l1.shape[0]
    n = tile_rows // _SUBLANES
    # Reduce only the leading (vreg-stacking) axis: VPU adds, no cross-lane
    # XLU reduction and no narrow masked stores in the hot loop.
    num_ref[0] = jnp.sum(masked_l1.reshape(n, _SUBLANES, _LANES), axis=0)
    den_ref[0] = jnp.sum(m.reshape(n, _SUBLANES, _LANES), axis=0)


def mask_l1_loss(result, target, mask, *, tile_rows=1024):
    """Pallas equivalent of MaskL1Loss.forward: sum(|r-t|*m) / sum(m)."""
    assert result.shape == target.shape == mask.shape

    if not jnp.issubdtype(mask.dtype, jnp.floating):
        mask = mask.astype(jnp.float32)

    total = math.prod(result.shape)
    rows_needed = pl.cdiv(total, _LANES)

    # Pick a tile no larger than the data, multiple of 8 sublanes.
    tile_rows = max(_SUBLANES, min(tile_rows, pl.cdiv(rows_needed, _SUBLANES) * _SUBLANES))
    tile_rows = pl.cdiv(tile_rows, _SUBLANES) * _SUBLANES

    chunk = tile_rows * _LANES
    num_blocks = pl.cdiv(total, chunk)
    padded = num_blocks * chunk
    rows = padded // _LANES

    def _prep(x):
        flat = x.reshape(-1)
        if padded != total:
            # Zero padding is exact: |0-0|*0 == 0 and pad mask == 0.
            flat = jnp.pad(flat, (0, padded - total))
        return flat.reshape(rows, _LANES)

    r2, t2, m2 = _prep(result), _prep(target), _prep(mask)

    in_block = pl.BlockSpec((tile_rows, _LANES), lambda i: (i, 0))
    out_block = pl.BlockSpec((1, _SUBLANES, _LANES), lambda i: (i, 0, 0))

    bytes_in = (r2.size * r2.dtype.itemsize
                + t2.size * t2.dtype.itemsize
                + m2.size * m2.dtype.itemsize)
    bytes_out = 2 * num_blocks * _SUBLANES * _LANES * 4

    num_p, den_p = pl.pallas_call(
        _mask_l1_kernel,
        out_shape=(
            jax.ShapeDtypeStruct((num_blocks, _SUBLANES, _LANES), jnp.float32),
            jax.ShapeDtypeStruct((num_blocks, _SUBLANES, _LANES), jnp.float32),
        ),
        grid_spec=pltpu.PrefetchScalarGridSpec(
            num_scalar_prefetch=0,
            grid=(num_blocks,),
            in_specs=[in_block, in_block, in_block],
            out_specs=[out_block, out_block],
        ),
        compiler_params=pltpu.CompilerParams(
            # Independent per-block partials -> shardable across TCs (v7x).
            dimension_semantics=("parallel",),
        ),
        cost_estimate=pl.CostEstimate(
            flops=4 * total,           # sub, abs, mul, add per element (approx)
            transcendentals=0,
            bytes_accessed=bytes_in + bytes_out,
        ),
    )(r2, t2, m2)

    num = jnp.sum(num_p)
    den = jnp.sum(den_p)
    # TODO(synk): den == 0 (fully masked batch) yields NaN/Inf, same as PyTorch.
    return (num / den).astype(jnp.float32)


def mask_l1_loss_ref(result, target, mask):
    l1 = jnp.abs(result - target)
    return jnp.sum(l1 * mask) / jnp.sum(mask)


if __name__ == "__main__":
    key = jax.random.PRNGKey(0)
    k1, k2 = jax.random.split(key)

    B, D, T = 2, 32, 16  # small mel-spectrogram-like shapes
    result = jax.random.normal(k1, (B, D, T), dtype=jnp.float32)
    target = jax.random.normal(k2, (B, D, T), dtype=jnp.float32)

    # Binary time mask (valid frames = 1), broadcast over feature dim.
    lengths = jnp.array([12, 7], dtype=jnp.int32)
    time_idx = jnp.arange(T)[None, :] < lengths[:, None]          # (B, T)
    mask = jnp.broadcast_to(time_idx[:, None, :], (B, D, T)).astype(jnp.float32)

    loss = mask_l1_loss(result, target, mask)
    jax.block_until_ready(loss)

    ref = mask_l1_loss_ref(result, target, mask)
    assert jnp.allclose(loss, ref, rtol=1e-5, atol=1e-5), (loss, ref)

    print("KERNEL_OK")
</pallas_src>

<mosaic_0001>
module attributes {stable_mosaic.version = 11 : i64} {
  func.func @_mask_l1_kernel(%arg0: i32, %arg1: memref<8x128xf32, #tpu.memory_space<vmem>>, %arg2: memref<8x128xf32, #tpu.memory_space<vmem>>, %arg3: memref<8x128xf32, #tpu.memory_space<vmem>>, %arg4: memref<1x8x128xf32, #tpu.memory_space<vmem>>, %arg5: memref<1x8x128xf32, #tpu.memory_space<vmem>>) attributes {dimension_semantics = [#tpu.dimension_semantics<parallel>], iteration_bounds = array<i64: 1>, scalar_prefetch = 0 : i64, scratch_operands = 0 : i64, tpu.core_type = #tpu.core_type<tc>, window_params = [{transform_indices = @transform_0, window_bounds = array<i64: 8, 128>}, {transform_indices = @transform_1, window_bounds = array<i64: 8, 128>}, {transform_indices = @transform_2, window_bounds = array<i64: 8, 128>}, {transform_indices = @transform_3, window_bounds = array<i64: 1, 8, 128>}, {transform_indices = @transform_4, window_bounds = array<i64: 1, 8, 128>}]} {
    %c0 = arith.constant 0 : index
    %c0_0 = arith.constant 0 : index
    %0 = vector.load %arg1[%c0, %c0_0] : memref<8x128xf32, #tpu.memory_space<vmem>>, vector<8x128xf32>
    %c0_1 = arith.constant 0 : index
    %c0_2 = arith.constant 0 : index
    %1 = vector.load %arg2[%c0_1, %c0_2] : memref<8x128xf32, #tpu.memory_space<vmem>>, vector<8x128xf32>
    %c0_3 = arith.constant 0 : index
    %c0_4 = arith.constant 0 : index
    %2 = vector.load %arg3[%c0_3, %c0_4] : memref<8x128xf32, #tpu.memory_space<vmem>>, vector<8x128xf32>
    %3 = arith.subf %0, %1 : vector<8x128xf32>
    %4 = math.absf %3 : vector<8x128xf32>
    %5 = arith.mulf %4, %2 : vector<8x128xf32>
    %6 = vector.shape_cast %5 : vector<8x128xf32> to vector<1x8x128xf32>
    %cst = arith.constant dense<0.000000e+00> : vector<8x128xf32>
    %7 = vector.multi_reduction <add>, %6, %cst [0] : vector<1x8x128xf32> to vector<8x128xf32>
    %c0_5 = arith.constant 0 : index
    %c0_6 = arith.constant 0 : index
    %c0_7 = arith.constant 0 : index
    %8 = vector.load %arg4[%c0_5, %c0_6, %c0_7] : memref<1x8x128xf32, #tpu.memory_space<vmem>>, vector<1x8x128xf32>
    %9 = vector.shape_cast %8 : vector<1x8x128xf32> to vector<8x128xf32>
    %10 = vector.shape_cast %7 : vector<8x128xf32> to vector<1x8x128xf32>
    tpu.vector_store %arg4[%c0_5, %c0_6, %c0_7], %10 {strides = array<i32>} : memref<1x8x128xf32, #tpu.memory_space<vmem>>, vector<1x8x128xf32>,
    %11 = vector.shape_cast %2 : vector<8x128xf32> to vector<1x8x128xf32>
    %cst_8 = arith.constant dense<0.000000e+00> : vector<8x128xf32>
    %12 = vector.multi_reduction <add>, %11, %cst_8 [0] : vector<1x8x128xf32> to vector<8x128xf32>
    %c0_9 = arith.constant 0 : index
    %c0_10 = arith.constant 0 : index
    %c0_11 = arith.constant 0 : index
    %13 = vector.load %arg5[%c0_9, %c0_10, %c0_11] : memref<1x8x128xf32, #tpu.memory_space<vmem>>, vector<1x8x128xf32>
    %14 = vector.shape_cast %13 : vector<1x8x128xf32> to vector<8x128xf32>
    %15 = vector.shape_cast %12 : vector<8x128xf32> to vector<1x8x128xf32>
    tpu.vector_store %arg5[%c0_9, %c0_10, %c0_11], %15 {strides = array<i32>} : memref<1x8x128xf32, #tpu.memory_space<vmem>>, vector<1x8x128xf32>,
    return
  }
  func.func @transform_0(%arg0: i32) -> (i32, i32) {
    %c0_i32 = arith.constant 0 : i32
    %c0_i32_0 = arith.constant 0 : i32
    return %arg0, %c0_i32 : i32, i32
  }
  func.func @transform_1(%arg0: i32) -> (i32, i32) {
    %c0_i32 = arith.constant 0 : i32
    %c0_i32_0 = arith.constant 0 : i32
    return %arg0, %c0_i32 : i32, i32
  }
  func.func @transform_2(%arg0: i32) -> (i32, i32) {
    %c0_i32 = arith.constant 0 : i32
    %c0_i32_0 = arith.constant 0 : i32
    return %arg0, %c0_i32 : i32, i32
  }
  func.func @transform_3(%arg0: i32) -> (i32, i32, i32) {
    %c0_i32 = arith.constant 0 : i32
    %c0_i32_0 = arith.constant 0 : i32
    %c0_i32_1 = arith.constant 0 : i32
    return %arg0, %c0_i32, %c0_i32_0 : i32, i32, i32
  }
  func.func @transform_4(%arg0: i32) -> (i32, i32, i32) {
    %c0_i32 = arith.constant 0 : i32
    %c0_i32_0 = arith.constant 0 : i32
    %c0_i32_1 = arith.constant 0 : i32
    return %arg0, %c0_i32, %c0_i32_0 : i32, i32, i32
  }
}

</mosaic_0001>

<bundles_post_ra>
// kernel: tpu_custom_call.1
= control target key start
LH: loop header
LB: loop body
LE: loop exit
PB: predicated region body
PF: predicated region fallthrough
CT: control target
= control target key end

     0   :  { %10 = vsyncpa [#allocation3], 0  ;;  %s306_s0 = inlined_call_operand.hbm [shape: f32[8,128], index: 0, kind: input, shape index: {}]   ;;  %s307_s1 = inlined_call_operand.hbm [shape: f32[8,128], index: 1, kind: input, shape index: {}]   ;;  %s308_s2 = inlined_call_operand.hbm [shape: f32[8,128], index: 2, kind: input, shape index: {}]   ;;  %s309_s3 = inlined_call_operand.hbm [shape: f32[1,8,128], index: 3, kind: output, shape index: {0}]   ;;  %s310_s4 = inlined_call_operand.hbm [shape: f32[1,8,128], index: 4, kind: output, shape index: {1}]  }
   0x1   :  { %11 = vsyncpa [#allocation6], 0 }
   0x2   :  { %12 = vsyncpa [#allocation4], 0 }
   0x3   :  { %13 = vsyncpa [#allocation10], 0  ;;  %s216_s15 = smov [#allocation5]   ;;  %s217_s17 = smov [#allocation2]  }
   0x4   :  { %s30_s16 = sshll.u32 %s216_s15, 4  ;;  %s20_s18 = sshll.u32 %s217_s17, 4  ;;  %s31_s16 = int_to_ptr.vmem [resolvable:$true] %s30_s16  ;;  %s21_s18 = int_to_ptr.vmem [resolvable:$true] %s20_s18 }
   0x5   :  { %s98_s21 = scalar_lea.hbm %s307_s1, 128 }
   0x6   :  { %p99_p0 = scmp.ne.s32.totalorder %s307_s1, %s98_s21  ;;  %p102_p1 = scmp.lt.u32.totalorder %s98_s21, %s307_s1 }
   0x8   :  { %p104_p2 = pnand %p102_p1, %p99_p0 }
   0xa   :  { %107 = shalt.err (!%p104_p2)
}
   0xb   :  { %s108_s26 = scalar_lea.vmem %s31_s16, 128  ;;  %p113_p4 = scmp.lt.s32.totalorder %s31_s16, %s31_s16 }
   0xc   :  { %p109_p3 = scmp.ne.s32.totalorder %s31_s16, %s108_s26  ;;  %p114_p5 = scmp.lt.s32.totalorder %s108_s26, %s108_s26 }
   0xe   :  { %p115_p6 = por %p114_p5, %p113_p4 }
  0x10   :  { %p116_p7 = pnand %p115_p6, %p109_p3 }
  0x12   :  { %119 = shalt.err (!%p116_p7)
}
  0x13   :  { %33 = dma.hbm_to_vmem [thread:$0]  %s307_s1, 128, %s31_s16, [#allocation6]  }
  0x14   :  { %s120_s5 = scalar_lea.hbm %s306_s0, 128 }
  0x15   :  { %p121_p8 = scmp.ne.s32.totalorder %s306_s0, %s120_s5  ;;  %p124_p9 = scmp.lt.u32.totalorder %s120_s5, %s306_s0 }
  0x17   :  { %p126_p10 = pnand %p124_p9, %p121_p8 }
  0x19   :  { %129 = shalt.err (!%p126_p10)
}
  0x1a   :  { %s130_s10 = scalar_lea.vmem %s21_s18, 128  ;;  %p135_p12 = scmp.lt.s32.totalorder %s21_s18, %s21_s18 }
  0x1b   :  { %p131_p11 = scmp.ne.s32.totalorder %s21_s18, %s130_s10  ;;  %p136_p13 = scmp.lt.s32.totalorder %s130_s10, %s130_s10 }
  0x1d   :  { %p137_p0 = por %p136_p13, %p135_p12 }
  0x1f   :  { %p138_p1 = pnand %p137_p0, %p131_p11 }
  0x21   :  { %141 = shalt.err (!%p138_p1)
}
  0x22   :  { %23 = dma.hbm_to_vmem [thread:$0]  %s306_s0, 128, %s21_s18, [#allocation3]  }
  0x23   :  { %s218_s12 = smov [#allocation7]   ;;  %s142_s16 = scalar_lea.hbm %s308_s2, 128 }
  0x24   :  { %s40_s13 = sshll.u32 %s218_s12, 4  ;;  %p143_p2 = scmp.ne.s32.totalorder %s308_s2, %s142_s16  ;;  %s41_s13 = int_to_ptr.vmem [resolvable:$true] %s40_s13 }
  0x25   :  { %p146_p3 = scmp.lt.u32.totalorder %s142_s16, %s308_s2 }
  0x27   :  { %p148_p4 = pnand %p146_p3, %p143_p2 }
  0x29   :  { %151 = shalt.err (!%p148_p4)
}
  0x2a   :  { %s152_s22 = scalar_lea.vmem %s41_s13, 128  ;;  %p157_p6 = scmp.lt.s32.totalorder %s41_s13, %s41_s13 }
  0x2b   :  { %p153_p5 = scmp.ne.s32.totalorder %s41_s13, %s152_s22  ;;  %p158_p7 = scmp.lt.s32.totalorder %s152_s22, %s152_s22 }
  0x2d   :  { %p159_p8 = por %p158_p7, %p157_p6 }
  0x2f   :  { %p160_p9 = pnand %p159_p8, %p153_p5 }
  0x31   :  { %163 = shalt.err (!%p160_p9)
}
  0x32   :  { %43 = dma.hbm_to_vmem [thread:$0]  %s308_s2, 128, %s41_s13, [#allocation6]  }
  0x33   :  { %208 = dma.done.wait [#allocation3], 128  }
  0x34   :  { %209 = vsyncadd [#allocation3], 4294967168 }
  0x35   :  { %210 = dma.done.wait [#allocation6], 256  }
  0x36   :  { %211 = vsyncadd [#allocation6], 4294967040  ;;  %s219_s23 = smov [#allocation9]   ;;  %v53_v0 = vld [vmem:[#allocation2] sm:$0xff]  ;;  %v54_v1 = vld [vmem:[#allocation5] sm:$0xff]  ;;  %s220_s25 = smov [#allocation8]  }
  0x37   :  { %s79_s24 = sshll.u32 %s219_s23, 4  ;;  %v55_v2 = vld [vmem:[#allocation7] sm:$0xff]  ;;  %v56_v3 = vsub.f32 %v53_v0, %v54_v1  ;;  %s69_s26 = sshll.u32 %s220_s25, 4  ;;  %s80_s24 = int_to_ptr.vmem [resolvable:$true] %s79_s24  ;;  %s70_s26 = int_to_ptr.vmem [resolvable:$true] %s69_s26 }
  0x38   :  { %62 = vst [vmem:[#allocation9] sm:$0xff] %v55_v2  ;;  %s164_s27 = scalar_lea.vmem %s80_s24, 128  ;;  %p169_p11 = scmp.lt.s32.totalorder %s80_s24, %s80_s24 }
  0x39   :  { %p165_p10 = scmp.ne.s32.totalorder %s80_s24, %s164_s27  ;;  %p170_p12 = scmp.lt.s32.totalorder %s164_s27, %s164_s27 }
  0x3b   :  { %p171_p13 = por %p170_p12, %p169_p11 }
  0x3d   :  { %p172_p0 = pnand %p171_p13, %p165_p10 }
  0x3f   :  { %175 = shalt.err (!%p172_p0)
}
  0x40   :  { %s176_s29 = scalar_lea.hbm %s310_s4, 128 }
  0x41   :  { %p177_p1 = scmp.ne.s32.totalorder %s310_s4, %s176_s29  ;;  %p180_p2 = scmp.lt.u32.totalorder %s176_s29, %s310_s4 }
  0x43   :  { %p182_p3 = pnand %p180_p2, %p177_p1 }
  0x45   :  { %185 = shalt.err (!%p182_p3)
}
  0x46   :  { %82 = dma.vmem_to_hbm [thread:$0]  %s80_s24, 128, %s310_s4, [#allocation10]   ;;  %v57_v4 = vand.u32 2147483647, %v56_v3 }
  0x47   :  { %s186_s10 = scalar_lea.vmem %s70_s26, 128  ;;  %p191_p5 = scmp.lt.s32.totalorder %s70_s26, %s70_s26 }
  0x48   :  { %v58_v5 = vmul.f32 %v57_v4, %v55_v2  ;;  %p187_p4 = scmp.ne.s32.totalorder %s70_s26, %s186_s10  ;;  %p192_p6 = scmp.lt.s32.totalorder %s186_s10, %s186_s10 }
  0x4a   :  { %60 = vst [vmem:[#allocation8] sm:$0xff] %v58_v5  ;;  %p193_p7 = por %p192_p6, %p191_p5 }
  0x4c   :  { %p194_p8 = pnand %p193_p7, %p187_p4 }
  0x4e   :  { %197 = shalt.err (!%p194_p8)
}
  0x4f   :  { %s198_s12 = scalar_lea.hbm %s309_s3, 128 }
  0x50   :  { %p199_p9 = scmp.ne.s32.totalorder %s309_s3, %s198_s12  ;;  %p202_p10 = scmp.lt.u32.totalorder %s198_s12, %s309_s3 }
  0x52   :  { %p204_p11 = pnand %p202_p10, %p199_p9 }
  0x54   :  { %207 = shalt.err (!%p204_p11)
}
  0x55   :  { %72 = dma.vmem_to_hbm [thread:$0]  %s70_s26, 128, %s309_s3, [#allocation4]  }
  0x56   :  { %212 = dma.done.wait [#allocation4], 128  }
  0x57   :  { %213 = vsyncadd [#allocation4], 4294967168 }
  0x58   :  { %214 = dma.done.wait [#allocation10], 128  }
  0x59   :  { %215 = vsyncadd [#allocation10], 4294967168 }
  0x5a   :  { %89 = vsyncpa [#allocation3], 1 }
  0x5b   :  { %90 = vsyncpa [#allocation6], 1 }
  0x5c   :  { %91 = vsyncpa [#allocation4], 1 }
  0x5d   :  { %92 = vsyncpa [#allocation10], 1 }

</bundles_post_ra>
